<compile_context>
chip_gen: v7x
topology: tpu7x:2x2x1
jax: 0.10.0
libtpu: 0.0.40
codegen_flags: <defaults>
</compile_context>

<pallas_src>
import functools

import jax
import jax.numpy as jnp
from jax.experimental import pallas as pl
from jax.experimental.pallas import tpu as pltpu


# Packed-row tiling knobs (rows are "packed" rows: PACK batch rows per row).
PACK = 4                      # batch rows packed per kernel row (K = PACK*Din)
TARGET_TILE_ROWS = 4096       # ~2 MB x + ~4 MB y per grid step at K=128,N=256
MIN_MULTISTEP_ROWS = 512      # below this, a single full-extent block is best
VMEM_LIMIT_BYTES = 32 * 1024 * 1024   # fits v5e/v6e/v7x with headroom


# ----------------------------- Pallas kernel ------------------------------ #
def linear_kernel(x_ref, w_ref, b_ref, o_ref):
    """o = x @ W + b with f32 accumulation.

    x: [TR, K]   (K = PACK*Din = 128, lane-dense packed input)
    W: [K, N]    (N = PACK*Dout = 256, block-diagonal packed weight)
    b: [1, N]
    o: [TR, N]   (lane-dense: N = 256 -> unmasked vst)
    """
    acc = jnp.dot(x_ref[...], w_ref[...], preferred_element_type=jnp.float32)
    o_ref[...] = (acc + b_ref[...]).astype(o_ref.dtype)


def _choose_tile_rows(R, target=TARGET_TILE_ROWS):
    """Pick the packed-row tile size.

    * Small R -> one full-extent block (legal even if R % 8 != 0).
    * Large R -> an even number of steps (>= 2) so both v7x TensorCores get
      work, each step <= `target` rows, tile rounded to a sublane multiple.
    """
    if R <= MIN_MULTISTEP_ROWS:
        return R
    n_steps = 2 * pl.cdiv(R, 2 * target)          # even, >= 2
    tr = pl.cdiv(R, n_steps)
    tr = ((tr + 7) // 8) * 8                      # non-full-extent => multiple of 8
    return tr


def pallas_linear_packed(x2, w2, b2):
    """Row-tiled lane-dense linear.  x2:[R,K], w2:[K,N], b2:[1,N] -> [R,N]."""
    R, K = x2.shape
    N = w2.shape[1]
    out_dtype = x2.dtype

    tr = _choose_tile_rows(R)
    grid = (pl.cdiv(R, tr),)   # last block may be partial; OOB writes are masked
    vmem = pltpu.MemorySpace.VMEM

    itemsize = jnp.dtype(out_dtype).itemsize
    cost = pl.CostEstimate(
        flops=2 * R * K * N,
        transcendentals=0,
        bytes_accessed=(R * K + K * N + N + R * N) * itemsize,
    )

    return pl.pallas_call(
        linear_kernel,
        out_shape=jax.ShapeDtypeStruct((R, N), out_dtype),
        grid=grid,
        in_specs=[
            pl.BlockSpec((tr, K), lambda i: (i, 0), memory_space=vmem),
            # Weights / bias: same block every step -> stay VMEM-resident.
            pl.BlockSpec((K, N), lambda i: (0, 0), memory_space=vmem),
            pl.BlockSpec((1, N), lambda i: (0, 0), memory_space=vmem),
        ],
        out_specs=pl.BlockSpec((tr, N), lambda i: (i, 0), memory_space=vmem),
        compiler_params=pltpu.CompilerParams(
            dimension_semantics=("parallel",),
            vmem_limit_bytes=VMEM_LIMIT_BYTES,
        ),
        cost_estimate=cost,
    )(x2, w2, b2)


# Jitted end-to-end forward: pack -> pallas -> unpack, fused by XLA.
@functools.partial(jax.jit, static_argnames=("dout",))
def _packed_linear_forward(x, w_packed, b_packed, *, dout):
    batch, din = x.shape
    pack = w_packed.shape[0] // din
    pad = (-batch) % pack
    if pad:
        x = jnp.pad(x, ((0, pad), (0, 0)))
    rows = x.shape[0] // pack
    x2 = x.reshape(rows, pack * din)                    # [B/PACK, PACK*Din]
    y2 = pallas_linear_packed(x2, w_packed, b_packed)   # [B/PACK, PACK*Dout]
    return y2.reshape(rows * pack, dout)[:batch]


# ----------------------- ModuleWithStorage equivalent ---------------------- #
def get_storage_offsets(named_tensors):
    """Byte offsets, exactly like ModuleWithStorage.get_storage_offsets."""
    offsets = {}
    edge = 0
    for name, t in named_tensors.items():
        nbytes = t.size * jnp.dtype(t.dtype).itemsize
        offsets[name] = (edge, edge + nbytes)
        edge += nbytes
    return offsets


class ModuleWithStorage:
    """JAX analogue of the PyTorch wrapper, specialized to nn.Linear(Din, Dout).

    All parameters live in one flat float32 storage buffer; forward delegates
    to the wrapped linear whose hot path runs in a single Pallas kernel.
    """

    def __init__(self, named_params, offsets=None):
        # TODO(synk): only f32 params supported in the flat storage emulation
        # (the torch version supports arbitrary dtypes via UntypedStorage).
        for p in named_params.values():
            assert jnp.dtype(p.dtype) == jnp.float32

        self.shapes = {k: v.shape for k, v in named_params.items()}
        self.dtypes = {k: jnp.dtype(v.dtype) for k, v in named_params.items()}
        self.offsets = (
            get_storage_offsets(named_params) if offsets is None else offsets
        )

        storage_size_bytes = max(end for _, end in self.offsets.values())
        assert storage_size_bytes % 4 == 0
        flat = jnp.zeros((storage_size_bytes // 4,), jnp.float32)
        for name, p in named_params.items():
            start, _ = self.offsets[name]
            n = p.size
            flat = flat.at[start // 4 : start // 4 + n].set(
                p.reshape(-1).astype(jnp.float32)
            )
        self.storage = flat  # the shared flat storage (float32 elements)

        # ---- One-time layout plumbing (hoisted out of forward) ----
        w = self._view("weight")            # [Dout, Din] (nn.Linear convention)
        b = self._view("bias")              # [Dout]
        self.dout, self.din = w.shape
        wt = w.T                            # [Din, Dout] -> clean MXU orientation

        # Block-diagonal packed weight: PACK batch rows per lane-dense kernel
        # row (K = PACK*Din = 128 lanes in, N = PACK*Dout = 256 lanes out).
        # Built once; stays VMEM-resident across the grid.
        k2, n2 = PACK * self.din, PACK * self.dout
        w_packed = jnp.zeros((k2, n2), jnp.float32)
        for p in range(PACK):
            w_packed = w_packed.at[
                p * self.din : (p + 1) * self.din,
                p * self.dout : (p + 1) * self.dout,
            ].set(wt)
        self.w_packed = w_packed                                       # [128, 256]
        self.b_packed = jnp.tile(b.reshape(1, self.dout), (1, PACK))   # [1, 256]

    def _view(self, name):
        """Static (compile-time) view of a parameter from the flat storage."""
        start, end = self.offsets[name]
        return (
            self.storage[start // 4 : end // 4]
            .reshape(self.shapes[name])
            .astype(self.dtypes[name])
        )

    def forward(self, x):
        """y = x @ W.T + b  via the lane-dense packed Pallas kernel."""
        batch, din = x.shape
        assert din == self.din
        return _packed_linear_forward(
            x, self.w_packed, self.b_packed, dout=self.dout
        )

    __call__ = forward


# --------------------------------- main ------------------------------------ #
if __name__ == "__main__":
    B, D_IN, D_OUT = 8, 32, 64

    key = jax.random.PRNGKey(0)
    kx, kw, kb = jax.random.split(key, 3)

    # Deterministic synthetic parameters (nn.Linear(32, 64) shapes).
    weight = jax.random.normal(kw, (D_OUT, D_IN), jnp.float32) * 0.05
    bias = jax.random.normal(kb, (D_OUT,), jnp.float32) * 0.05
    x = jax.random.normal(kx, (B, D_IN), jnp.float32)

    module = ModuleWithStorage({"weight": weight, "bias": bias})

    # Multiple-of-PACK batch path.
    y = jax.block_until_ready(module(x))
    y_ref = x @ weight.T + bias
    assert y.shape == (B, D_OUT)
    assert jnp.allclose(y, y_ref, atol=1e-5, rtol=1e-5)

    # Non-multiple-of-PACK batch path (exercises the pad/unpack logic).
    x_odd = x[:5]
    y_odd = jax.block_until_ready(module(x_odd))
    assert y_odd.shape == (5, D_OUT)
    assert jnp.allclose(y_odd, x_odd @ weight.T + bias, atol=1e-5, rtol=1e-5)

    # Larger batch to exercise the multi-step (megacore-friendly) grid and the
    # non-divisible last block (write-masked OOB rows).
    x_big = jax.random.normal(kx, (4 * MIN_MULTISTEP_ROWS * PACK + 12, D_IN),
                              jnp.float32)
    y_big = jax.block_until_ready(module(x_big))
    assert jnp.allclose(y_big, x_big @ weight.T + bias, atol=1e-4, rtol=1e-4)

    print("KERNEL_OK")
</pallas_src>

<mosaic_0001>
module attributes {stable_mosaic.version = 11 : i64} {
  func.func @linear_kernel(%arg0: i32, %arg1: memref<2x128xf32, #tpu.memory_space<vmem>>, %arg2: memref<128x256xf32, #tpu.memory_space<vmem>>, %arg3: memref<1x256xf32, #tpu.memory_space<vmem>>, %arg4: memref<2x256xf32, #tpu.memory_space<vmem>>) attributes {dimension_semantics = [#tpu.dimension_semantics<parallel>], iteration_bounds = array<i64: 1>, scalar_prefetch = 0 : i64, scratch_operands = 0 : i64, tpu.core_type = #tpu.core_type<tc>, window_params = [{transform_indices = @transform_0, window_bounds = array<i64: 2, 128>}, {pipeline_mode = #tpu.pipeline_mode<synchronous>, transform_indices = @transform_1, window_bounds = array<i64: 128, 256>}, {pipeline_mode = #tpu.pipeline_mode<synchronous>, transform_indices = @transform_2, window_bounds = array<i64: 1, 256>}, {transform_indices = @transform_3, window_bounds = array<i64: 2, 256>}]} {
    %c0 = arith.constant 0 : index
    %c0_0 = arith.constant 0 : index
    %0 = vector.load %arg1[%c0, %c0_0] : memref<2x128xf32, #tpu.memory_space<vmem>>, vector<2x128xf32>
    %c0_1 = arith.constant 0 : index
    %c0_2 = arith.constant 0 : index
    %1 = vector.load %arg2[%c0_1, %c0_2] : memref<128x256xf32, #tpu.memory_space<vmem>>, vector<128x256xf32>
    %cst = arith.constant dense<0.000000e+00> : vector<2x256xf32>
    %2 = tpu.matmul %0, %1, %cst {dimension_numbers = #tpu.dot_dimension_numbers<[1], [0], [0], [1], [0, 0, 1, 1], [], []>} : vector<2x128xf32>, vector<128x256xf32>, vector<2x256xf32> -> vector<2x256xf32>
    %c0_3 = arith.constant 0 : index
    %c0_4 = arith.constant 0 : index
    %3 = vector.load %arg3[%c0_3, %c0_4] : memref<1x256xf32, #tpu.memory_space<vmem>>, vector<1x256xf32>
    %4 = vector.broadcast %3 : vector<1x256xf32> to vector<2x256xf32>
    %5 = arith.addf %2, %4 : vector<2x256xf32>
    %c0_5 = arith.constant 0 : index
    %c0_6 = arith.constant 0 : index
    %6 = vector.load %arg4[%c0_5, %c0_6] : memref<2x256xf32, #tpu.memory_space<vmem>>, vector<2x256xf32>
    tpu.vector_store %arg4[%c0_5, %c0_6], %5 {strides = array<i32>} : memref<2x256xf32, #tpu.memory_space<vmem>>, vector<2x256xf32>,
    return
  }
  func.func @transform_0(%arg0: i32) -> (i32, i32) {
    %c0_i32 = arith.constant 0 : i32
    %c0_i32_0 = arith.constant 0 : i32
    return %arg0, %c0_i32 : i32, i32
  }
  func.func @transform_1(%arg0: i32) -> (i32, i32) {
    %c0_i32 = arith.constant 0 : i32
    %c0_i32_0 = arith.constant 0 : i32
    %c0_i32_1 = arith.constant 0 : i32
    return %c0_i32, %c0_i32_0 : i32, i32
  }
  func.func @transform_2(%arg0: i32) -> (i32, i32) {
    %c0_i32 = arith.constant 0 : i32
    %c0_i32_0 = arith.constant 0 : i32
    %c0_i32_1 = arith.constant 0 : i32
    return %c0_i32, %c0_i32_0 : i32, i32
  }
  func.func @transform_3(%arg0: i32) -> (i32, i32) {
    %c0_i32 = arith.constant 0 : i32
    %c0_i32_0 = arith.constant 0 : i32
    return %arg0, %c0_i32 : i32, i32
  }
}

</mosaic_0001>

<bundles_post_ra>
// kernel: _packed_linear_forward.1
= control target key start
LH: loop header
LB: loop body
LE: loop exit
PB: predicated region body
PF: predicated region fallthrough
CT: control target
= control target key end

     0   :  { %8 = vsyncpa [#allocation3], 0  ;;  %s222_s12 = smov [#allocation2]   ;;  %s267_s0 = inlined_call_operand.vmem [shape: f32[2,128], index: 0, kind: input, shape index: {}]   ;;  %s268_s1 = inlined_call_operand.hbm [shape: f32[128,256], index: 1, kind: input, shape index: {}]   ;;  %s269_s2 = inlined_call_operand.vmem [shape: f32[1,256], index: 2, kind: input, shape index: {}]   ;;  %s270_s3 = inlined_call_operand.vmem [shape: f32[2,256], index: 3, kind: output, shape index: {}]  }
   0x1   :  { %s16_s13 = sshll.u32 %s222_s12, 4  ;;  %s198_s16 = scalar_lea.hbm %s268_s1, 4096  ;;  %s17_s13 = int_to_ptr.vmem [resolvable:$true] %s16_s13 }
   0x2   :  { %p199_p0 = scmp.ne.s32.totalorder %s268_s1, %s198_s16  ;;  %p202_p1 = scmp.lt.u32.totalorder %s198_s16, %s268_s1 }
   0x4   :  { %p204_p2 = pnand %p202_p1, %p199_p0 }
   0x6   :  { %207 = shalt.err (!%p204_p2)
}
   0x7   :  { %s208_s21 = scalar_lea.vmem %s17_s13, 4096  ;;  %p213_p4 = scmp.lt.s32.totalorder %s17_s13, %s17_s13 }
   0x8   :  { %p209_p3 = scmp.ne.s32.totalorder %s17_s13, %s208_s21  ;;  %p214_p5 = scmp.lt.s32.totalorder %s208_s21, %s208_s21 }
   0xa   :  { %p215_p6 = por %p214_p5, %p213_p4 }
   0xc   :  { %p216_p7 = pnand %p215_p6, %p209_p3 }
   0xe   :  { %219 = shalt.err (!%p216_p7)
}
   0xf   :  { %s223_s22 = smov 256   ;;  %s224_s23 = smov 16  }
  0x10   :  { %22 = dma.hbm_to_vmem [thread:$0]  %s268_s1, 4096, %s17_s13, [#allocation3], %s223_s22, %s223_s22, %s224_s23  }
  0x11   :  { %220 = dma.done.wait [#allocation3], 4096  }
  0x12   :  { %221 = vsyncadd [#allocation3], 4294963200  ;;  %v225_v0 = vmov 0.0   ;;  %v30_v1 = vld [vmem:[#allocation2 + $0x8] sm:$0xff]  ;;  %v32_v2 = vld [vmem:[#allocation2 + $0x18] sm:$0xff]  ;;  %v63_v50 = vlaneseq }
  0x13   :  { %137 = vmatprep.mubr.f32.mxu0 %v225_v0  ;;  %v29_v3 = vld [vmem:[#allocation2] sm:$0xff]  ;;  %v162_v4 = vpack.c.bf16 %v32_v2, %v30_v1  ;;  %v31_v5 = vld [vmem:[#allocation2 + $0x10] sm:$0xff]  ;;  %v34_v6 = vld [vmem:[#allocation2 + $0x28] sm:$0xff] }
  0x14   :  { %v36_v7 = vld [vmem:[#allocation2 + $0x38] sm:$0xff]  ;;  %v164_v8 = vpack.c.bf16 %v31_v5, %v29_v3  ;;  %v33_v10 = vld [vmem:[#allocation2 + $0x20] sm:$0xff]  ;;  %v35_v11 = vld [vmem:[#allocation2 + $0x30] sm:$0xff]  ;;  %v64_v51 = vshrl.u32 %v63_v50, 7 }
  0x15   :  { %v166_v9 = vpack.c.bf16 %v36_v7, %v34_v6  ;;  %v38_v12 = vld [vmem:[#allocation2 + $0x48] sm:$0xff]  ;;  %163 = vmatprep.subr.bf16.mxu0 %v162_v4  ;;  %v40_v13 = vld [vmem:[#allocation2 + $0x58] sm:$0xff]  ;;  %v168_v14 = vpack.c.bf16 %v35_v11, %v33_v10  ;;  %v37_v16 = vld [vmem:[#allocation2 + $0x40] sm:$0xff] }
  0x16   :  { %165 = vmatpush1.bf16.msra.mxu0 %v164_v8  ;;  %v170_v15 = vpack.c.bf16 %v40_v13, %v38_v12  ;;  %v39_v17 = vld [vmem:[#allocation2 + $0x50] sm:$0xff]  ;;  %v42_v18 = vld [vmem:[#allocation2 + $0x68] sm:$0xff]  ;;  %v44_v19 = vld [vmem:[#allocation2 + $0x78] sm:$0xff]  ;;  %v65_v52 = vsub.s32 0, %v64_v51  ;;  %v69_v54 = vsub.s32 1, %v64_v51 }
  0x17   :  { %167 = vmatprep.subr.bf16.mxu0 %v166_v9  ;;  %v172_v20 = vpack.c.bf16 %v39_v17, %v37_v16  ;;  %v174_v21 = vpack.c.bf16 %v44_v19, %v42_v18  ;;  %v41_v22 = vld [vmem:[#allocation2 + $0x60] sm:$0xff]  ;;  %v43_v23 = vld [vmem:[#allocation2 + $0x70] sm:$0xff]  ;;  %v46_v24 = vld [vmem:[#allocation2 + $0x88] sm:$0xff] }
  0x18   :  { %v48_v25 = vld [vmem:[#allocation2 + $0x98] sm:$0xff]  ;;  %v176_v26 = vpack.c.bf16 %v43_v23, %v41_v22  ;;  %v45_v28 = vld [vmem:[#allocation2 + $0x80] sm:$0xff]  ;;  %v47_v29 = vld [vmem:[#allocation2 + $0x90] sm:$0xff] }
  0x19   :  { %v178_v27 = vpack.c.bf16 %v48_v25, %v46_v24  ;;  %v50_v30 = vld [vmem:[#allocation2 + $0xa8] sm:$0xff]  ;;  %v52_v31 = vld [vmem:[#allocation2 + $0xb8] sm:$0xff]  ;;  %v180_v32 = vpack.c.bf16 %v47_v29, %v45_v28  ;;  %v49_v34 = vld [vmem:[#allocation2 + $0xa0] sm:$0xff] }
  0x1a   :  { %169 = vmatpush1.bf16.msra.mxu0 %v168_v14  ;;  %v182_v33 = vpack.c.bf16 %v52_v31, %v50_v30  ;;  %v51_v35 = vld [vmem:[#allocation2 + $0xb0] sm:$0xff]  ;;  %v54_v36 = vld [vmem:[#allocation2 + $0xc8] sm:$0xff]  ;;  %v56_v37 = vld [vmem:[#allocation2 + $0xd8] sm:$0xff] }
  0x1b   :  { %171 = vmatprep.subr.bf16.mxu0 %v170_v15  ;;  %v184_v38 = vpack.c.bf16 %v51_v35, %v49_v34  ;;  %v186_v39 = vpack.c.bf16 %v56_v37, %v54_v36  ;;  %v53_v40 = vld [vmem:[#allocation2 + $0xc0] sm:$0xff]  ;;  %v55_v41 = vld [vmem:[#allocation2 + $0xd0] sm:$0xff]  ;;  %v58_v42 = vld [vmem:[#allocation2 + $0xe8] sm:$0xff] }
  0x1c   :  { %v60_v43 = vld [vmem:[#allocation2 + $0xf8] sm:$0xff]  ;;  %v188_v44 = vpack.c.bf16 %v55_v41, %v53_v40  ;;  %v57_v46 = vld [vmem:[#allocation2 + $0xe0] sm:$0xff]  ;;  %v59_v47 = vld [vmem:[#allocation2 + $0xf0] sm:$0xff] }
  0x1d   :  { %v190_v45 = vpack.c.bf16 %v60_v43, %v58_v42  ;;  %v192_v48 = vpack.c.bf16 %v59_v47, %v57_v46  ;;  %v28_v49 = vld [vmem:[%s267_s0] sm:$0x3] }
  0x1e   :  { %173 = vmatpush1.bf16.msra.mxu0 %v172_v20  ;;  %v61_v53 = vld [vmem:[%s269_s2] sm:$0x3] }
  0x1f   :  { %175 = vmatprep.subr.bf16.mxu0 %v174_v21  ;;  %v66_v55 = vrot.slane %v61_v53, %v65_v52  ;;  %v70_v56 = vrot.slane %v61_v53, %v69_v54 }
  0x22   :  { %177 = vmatpush1.bf16.msra.mxu0 %v176_v26 }
  0x23   :  { %179 = vmatprep.subr.bf16.mxu0 %v178_v27 }
  0x26   :  { %181 = vmatpush1.bf16.msra.mxu0 %v180_v32 }
  0x27   :  { %183 = vmatprep.subr.bf16.mxu0 %v182_v33 }
  0x2a   :  { %185 = vmatpush1.bf16.msra.mxu0 %v184_v38 }
  0x2b   :  { %187 = vmatprep.subr.bf16.mxu0 %v186_v39 }
  0x2e   :  { %189 = vmatpush1.bf16.msra.mxu0 %v188_v44 }
  0x2f   :  { %191 = vmatprep.subr.bf16.mxu0 %v190_v45 }
  0x32   :  { %193 = vmatpush1.bf16.msra.mxu0 %v192_v48 }
  0x35   :  { %138 = vmatmul.mubr.f32.vlgmr.msra.gmra.mrb[0].mxu0 %v28_v49 }
 0x108   :  { %v139_v57 = vpop.f32.mrb[0].mxu0 }
 0x109   :  { %v140_v58 = vadd.f32 %v139_v57, %v66_v55  ;;  %v141_v59 = vpop.f32.mrb[1].mxu0 }
 0x10a   :  { %v142_v60 = vadd.f32 %v141_v59, %v70_v56 }
 0x10c   :  { %v146_v61 = vcombine.low %v140_v58, %v142_v60 }
 0x10e   :  { %161 = vst.sshfl [vmem:[%s270_s3] sm:$0x33 pattern:$0x76325410] %v146_v61 }
 0x10f   :  { %160 = vsyncpa [#allocation3], 1 }

</bundles_post_ra>
